<compile_context>
chip_gen: v7x
topology: tpu7x:2x2x1
jax: 0.10.0
libtpu: 0.0.40
codegen_flags: <defaults>
</compile_context>

<pallas_src>
import functools

import numpy as np
import jax
import jax.numpy as jnp
from jax.experimental import pallas as pl
from jax.experimental.pallas import tpu as pltpu


# ----------------------------------------------------------------------------
# Pallas kernel: one large batch block per grid step, compute in
# (feature, batch-lane) layout, bf16 MXU inputs with f32 accumulation.
# ----------------------------------------------------------------------------
def _make_kernel(residual, activation):
    if activation == "tanh":
        act = jnp.tanh
    elif activation == "relu":
        act = lambda v: jnp.maximum(v, 0.0)
    else:
        raise ValueError(f"unsupported activation: {activation}")

    dot = functools.partial(jnp.dot, preferred_element_type=jnp.float32)
    bf16 = jnp.bfloat16

    def kernel(x_ref, w1_ref, b1_ref, w2_ref, b2_ref, w3_ref, b3_ref,
               w4_ref, b4_ref, o_ref):
        # x_ref: (bn, in_dim) batch-major tile; transpose once in-kernel (XLU)
        x = x_ref[...]                                        # (bn, in_dim) f32
        xt = x.T                                              # (in_dim, bn) f32
        # Weights arrive in bf16; activations cast to bf16 only at dot inputs.
        h = act(dot(w1_ref[...], xt.astype(bf16)) + b1_ref[...])   # (h0, bn) f32
        h = act(dot(w2_ref[...], h.astype(bf16)) + b2_ref[...])    # (h1, bn) f32
        h = act(dot(w3_ref[...], h.astype(bf16)) + b3_ref[...])    # (h2, bn) f32
        out = dot(w4_ref[...], h.astype(bf16)) + b4_ref[...]       # (out, bn) f32
        if residual:
            out = out + xt                      # requires out_dim == in_dim, f32
        # Transpose back to batch-major and store the full tile.
        o_ref[...] = out.T.astype(o_ref.dtype)                # (bn, out_dim)

    return kernel


# ----------------------------------------------------------------------------
# Parameter setup (mirrors nn.Linear default init and shapes)
# ----------------------------------------------------------------------------
def make_params(key, input_dim, hidden_dim, output_dim):
    dims = [input_dim, hidden_dim[0], hidden_dim[1], hidden_dim[2], output_dim]
    params = {}
    keys = jax.random.split(key, 4)
    for i, k in enumerate(keys):
        fan_in, fan_out = dims[i], dims[i + 1]
        bound = 1.0 / float(np.sqrt(fan_in))
        kw, kb = jax.random.split(k)
        params[f"w{i + 1}"] = jax.random.uniform(
            kw, (fan_out, fan_in), jnp.float32, -bound, bound)
        params[f"b{i + 1}"] = jax.random.uniform(
            kb, (fan_out,), jnp.float32, -bound, bound)
    return params


# ----------------------------------------------------------------------------
# Wrapper: flatten batch, tile over batch (batch-major I/O, no XLA transposes)
# ----------------------------------------------------------------------------
def four_layer_nn(x, params, *, residual=True, activation="relu", block_b=2048):
    in_dim = params["w1"].shape[1]
    out_dim = params["w4"].shape[0]
    if residual and in_dim != out_dim:
        raise ValueError("residual=True requires input_dim == output_dim")

    bs = x.shape[:-1]
    xf = x.reshape(-1, in_dim).astype(jnp.float32)
    B = xf.shape[0]

    # Batch block: always a multiple of 128 (lane-dense in-kernel compute,
    # (8,128)-legal BlockSpec), capped at the padded batch size.
    bn = max(128, (int(block_b) // 128) * 128)
    b128 = ((B + 127) // 128) * 128
    bn = min(bn, b128)
    # Prefer >= 2 grid steps when the batch allows it (lets core-parallel
    # sharding use v7x's second TensorCore; negligible overhead elsewhere).
    if b128 >= 256 and bn >= b128:
        bn = ((b128 // 2 + 127) // 128) * 128
    Bp = ((B + bn - 1) // bn) * bn
    if Bp != B:
        xf = jnp.pad(xf, ((0, Bp - B), (0, 0)))               # (Bp, in_dim)

    # Weights in bf16 (MXU-native), biases in f32 as (h, 1) lane-broadcast cols.
    w1 = params["w1"].astype(jnp.bfloat16)
    w2 = params["w2"].astype(jnp.bfloat16)
    w3 = params["w3"].astype(jnp.bfloat16)
    w4 = params["w4"].astype(jnp.bfloat16)
    b1 = params["b1"][:, None].astype(jnp.float32)
    b2 = params["b2"][:, None].astype(jnp.float32)
    b3 = params["b3"][:, None].astype(jnp.float32)
    b4 = params["b4"][:, None].astype(jnp.float32)

    def const_spec(shape):
        # full-array block, constant block index -> resident across the grid
        return pl.BlockSpec(shape, lambda i: (0, 0))

    kernel = _make_kernel(residual, activation)

    out = pl.pallas_call(
        kernel,
        out_shape=jax.ShapeDtypeStruct((Bp, out_dim), jnp.float32),
        grid=(Bp // bn,),
        in_specs=[
            pl.BlockSpec((bn, in_dim), lambda i: (i, 0)),     # x block (batch-major)
            const_spec(w1.shape), const_spec(b1.shape),
            const_spec(w2.shape), const_spec(b2.shape),
            const_spec(w3.shape), const_spec(b3.shape),
            const_spec(w4.shape), const_spec(b4.shape),
        ],
        out_specs=pl.BlockSpec((bn, out_dim), lambda i: (i, 0)),
        compiler_params=pltpu.CompilerParams(
            dimension_semantics=("parallel",),
            vmem_limit_bytes=32 * 1024 * 1024),
    )(xf, w1, b1, w2, b2, w3, b3, w4, b4)

    return out[:B].reshape(*bs, out_dim)


# ----------------------------------------------------------------------------
# NumPy reference (matches the PyTorch forward semantics, f64)
# ----------------------------------------------------------------------------
def ref_forward(x, params, *, residual=True, activation="relu"):
    act = np.tanh if activation == "tanh" else (lambda v: np.maximum(v, 0.0))
    xf = np.asarray(x, np.float64)
    w = [np.asarray(params[f"w{i}"], np.float64) for i in range(1, 5)]
    b = [np.asarray(params[f"b{i}"], np.float64) for i in range(1, 5)]
    h = act(xf @ w[0].T + b[0])
    h = act(h @ w[1].T + b[1])
    h = act(h @ w[2].T + b[2])
    res = h @ w[3].T + b[3]
    return res + xf if residual else res


if __name__ == "__main__":
    key = jax.random.PRNGKey(0)
    kp, kx = jax.random.split(key)

    IN_DIM, HIDDEN, OUT_DIM = 32, (64, 48, 64), 32
    params = make_params(kp, IN_DIM, HIDDEN, OUT_DIM)

    # small example input: batch dims (2, 8), feature dim 32
    x = jax.random.normal(kx, (2, 8, IN_DIM), jnp.float32)

    out = four_layer_nn(x, params, residual=True, activation="relu")
    out = jax.block_until_ready(out)

    ref = ref_forward(np.asarray(x), params, residual=True, activation="relu")
    assert out.shape == (2, 8, OUT_DIM)
    np.testing.assert_allclose(np.asarray(out), ref, rtol=2e-2, atol=2e-2)
    print("KERNEL_OK")
</pallas_src>

<mosaic_0001>
module attributes {stable_mosaic.version = 11 : i64} {
  func.func @kernel(%arg0: i32, %arg1: memref<128x32xf32, #tpu.memory_space<vmem>>, %arg2: memref<64x32xbf16, #tpu.memory_space<vmem>>, %arg3: memref<64x1xf32, #tpu.memory_space<vmem>>, %arg4: memref<48x64xbf16, #tpu.memory_space<vmem>>, %arg5: memref<48x1xf32, #tpu.memory_space<vmem>>, %arg6: memref<64x48xbf16, #tpu.memory_space<vmem>>, %arg7: memref<64x1xf32, #tpu.memory_space<vmem>>, %arg8: memref<32x64xbf16, #tpu.memory_space<vmem>>, %arg9: memref<32x1xf32, #tpu.memory_space<vmem>>, %arg10: memref<128x32xf32, #tpu.memory_space<vmem>>) attributes {dimension_semantics = [#tpu.dimension_semantics<parallel>], iteration_bounds = array<i64: 1>, scalar_prefetch = 0 : i64, scratch_operands = 0 : i64, tpu.core_type = #tpu.core_type<tc>, window_params = [{transform_indices = @transform_0, window_bounds = array<i64: 128, 32>}, {pipeline_mode = #tpu.pipeline_mode<synchronous>, transform_indices = @transform_1, window_bounds = array<i64: 64, 32>}, {pipeline_mode = #tpu.pipeline_mode<synchronous>, transform_indices = @transform_2, window_bounds = array<i64: 64, 1>}, {pipeline_mode = #tpu.pipeline_mode<synchronous>, transform_indices = @transform_3, window_bounds = array<i64: 48, 64>}, {pipeline_mode = #tpu.pipeline_mode<synchronous>, transform_indices = @transform_4, window_bounds = array<i64: 48, 1>}, {pipeline_mode = #tpu.pipeline_mode<synchronous>, transform_indices = @transform_5, window_bounds = array<i64: 64, 48>}, {pipeline_mode = #tpu.pipeline_mode<synchronous>, transform_indices = @transform_6, window_bounds = array<i64: 64, 1>}, {pipeline_mode = #tpu.pipeline_mode<synchronous>, transform_indices = @transform_7, window_bounds = array<i64: 32, 64>}, {pipeline_mode = #tpu.pipeline_mode<synchronous>, transform_indices = @transform_8, window_bounds = array<i64: 32, 1>}, {transform_indices = @transform_9, window_bounds = array<i64: 128, 32>}]} {
    %c0 = arith.constant 0 : index
    %c0_0 = arith.constant 0 : index
    %0 = vector.load %arg1[%c0, %c0_0] : memref<128x32xf32, #tpu.memory_space<vmem>>, vector<128x32xf32>
    %1 = tpu.transpose %0, [1, 0] : vector<128x32xf32> -> vector<32x128xf32>
    %c0_1 = arith.constant 0 : index
    %c0_2 = arith.constant 0 : index
    %2 = vector.load %arg2[%c0_1, %c0_2] : memref<64x32xbf16, #tpu.memory_space<vmem>>, vector<64x32xbf16>
    %3 = arith.truncf %1 : vector<32x128xf32> to vector<32x128xbf16>
    %cst = arith.constant dense<0.000000e+00> : vector<64x128xf32>
    %4 = tpu.matmul %2, %3, %cst {dimension_numbers = #tpu.dot_dimension_numbers<[1], [0], [0], [1], [0, 0, 1, 1], [], []>} : vector<64x32xbf16>, vector<32x128xbf16>, vector<64x128xf32> -> vector<64x128xf32>
    %c0_3 = arith.constant 0 : index
    %c0_4 = arith.constant 0 : index
    %5 = vector.load %arg3[%c0_3, %c0_4] : memref<64x1xf32, #tpu.memory_space<vmem>>, vector<64x1xf32>
    %6 = vector.broadcast %5 : vector<64x1xf32> to vector<64x128xf32>
    %7 = arith.addf %4, %6 : vector<64x128xf32>
    %cst_5 = arith.constant 0.000000e+00 : f32
    %8 = vector.broadcast %cst_5 : f32 to vector<64x128xf32>
    %9 = arith.maximumf %7, %8 : vector<64x128xf32>
    %c0_6 = arith.constant 0 : index
    %c0_7 = arith.constant 0 : index
    %10 = vector.load %arg4[%c0_6, %c0_7] : memref<48x64xbf16, #tpu.memory_space<vmem>>, vector<48x64xbf16>
    %11 = arith.truncf %9 : vector<64x128xf32> to vector<64x128xbf16>
    %cst_8 = arith.constant dense<0.000000e+00> : vector<48x128xf32>
    %12 = tpu.matmul %10, %11, %cst_8 {dimension_numbers = #tpu.dot_dimension_numbers<[1], [0], [0], [1], [0, 0, 1, 1], [], []>} : vector<48x64xbf16>, vector<64x128xbf16>, vector<48x128xf32> -> vector<48x128xf32>
    %c0_9 = arith.constant 0 : index
    %c0_10 = arith.constant 0 : index
    %13 = vector.load %arg5[%c0_9, %c0_10] : memref<48x1xf32, #tpu.memory_space<vmem>>, vector<48x1xf32>
    %14 = vector.broadcast %13 : vector<48x1xf32> to vector<48x128xf32>
    %15 = arith.addf %12, %14 : vector<48x128xf32>
    %cst_11 = arith.constant 0.000000e+00 : f32
    %16 = vector.broadcast %cst_11 : f32 to vector<48x128xf32>
    %17 = arith.maximumf %15, %16 : vector<48x128xf32>
    %c0_12 = arith.constant 0 : index
    %c0_13 = arith.constant 0 : index
    %18 = vector.load %arg6[%c0_12, %c0_13] : memref<64x48xbf16, #tpu.memory_space<vmem>>, vector<64x48xbf16>
    %19 = arith.truncf %17 : vector<48x128xf32> to vector<48x128xbf16>
    %cst_14 = arith.constant dense<0.000000e+00> : vector<64x128xf32>
    %20 = tpu.matmul %18, %19, %cst_14 {dimension_numbers = #tpu.dot_dimension_numbers<[1], [0], [0], [1], [0, 0, 1, 1], [], []>} : vector<64x48xbf16>, vector<48x128xbf16>, vector<64x128xf32> -> vector<64x128xf32>
    %c0_15 = arith.constant 0 : index
    %c0_16 = arith.constant 0 : index
    %21 = vector.load %arg7[%c0_15, %c0_16] : memref<64x1xf32, #tpu.memory_space<vmem>>, vector<64x1xf32>
    %22 = vector.broadcast %21 : vector<64x1xf32> to vector<64x128xf32>
    %23 = arith.addf %20, %22 : vector<64x128xf32>
    %cst_17 = arith.constant 0.000000e+00 : f32
    %24 = vector.broadcast %cst_17 : f32 to vector<64x128xf32>
    %25 = arith.maximumf %23, %24 : vector<64x128xf32>
    %c0_18 = arith.constant 0 : index
    %c0_19 = arith.constant 0 : index
    %26 = vector.load %arg8[%c0_18, %c0_19] : memref<32x64xbf16, #tpu.memory_space<vmem>>, vector<32x64xbf16>
    %27 = arith.truncf %25 : vector<64x128xf32> to vector<64x128xbf16>
    %cst_20 = arith.constant dense<0.000000e+00> : vector<32x128xf32>
    %28 = tpu.matmul %26, %27, %cst_20 {dimension_numbers = #tpu.dot_dimension_numbers<[1], [0], [0], [1], [0, 0, 1, 1], [], []>} : vector<32x64xbf16>, vector<64x128xbf16>, vector<32x128xf32> -> vector<32x128xf32>
    %c0_21 = arith.constant 0 : index
    %c0_22 = arith.constant 0 : index
    %29 = vector.load %arg9[%c0_21, %c0_22] : memref<32x1xf32, #tpu.memory_space<vmem>>, vector<32x1xf32>
    %30 = vector.broadcast %29 : vector<32x1xf32> to vector<32x128xf32>
    %31 = arith.addf %28, %30 : vector<32x128xf32>
    %32 = arith.addf %31, %1 : vector<32x128xf32>
    %33 = tpu.transpose %32, [1, 0] : vector<32x128xf32> -> vector<128x32xf32>
    %c0_23 = arith.constant 0 : index
    %c0_24 = arith.constant 0 : index
    %34 = vector.load %arg10[%c0_23, %c0_24] : memref<128x32xf32, #tpu.memory_space<vmem>>, vector<128x32xf32>
    tpu.vector_store %arg10[%c0_23, %c0_24], %33 {strides = array<i32>} : memref<128x32xf32, #tpu.memory_space<vmem>>, vector<128x32xf32>,
    return
  }
  func.func @transform_0(%arg0: i32) -> (i32, i32) {
    %c0_i32 = arith.constant 0 : i32
    %c0_i32_0 = arith.constant 0 : i32
    return %arg0, %c0_i32 : i32, i32
  }
  func.func @transform_1(%arg0: i32) -> (i32, i32) {
    %c0_i32 = arith.constant 0 : i32
    %c0_i32_0 = arith.constant 0 : i32
    %c0_i32_1 = arith.constant 0 : i32
    return %c0_i32, %c0_i32_0 : i32, i32
  }
  func.func @transform_2(%arg0: i32) -> (i32, i32) {
    %c0_i32 = arith.constant 0 : i32
    %c0_i32_0 = arith.constant 0 : i32
    %c0_i32_1 = arith.constant 0 : i32
    return %c0_i32, %c0_i32_0 : i32, i32
  }
  func.func @transform_3(%arg0: i32) -> (i32, i32) {
    %c0_i32 = arith.constant 0 : i32
    %c0_i32_0 = arith.constant 0 : i32
    %c0_i32_1 = arith.constant 0 : i32
    return %c0_i32, %c0_i32_0 : i32, i32
  }
  func.func @transform_4(%arg0: i32) -> (i32, i32) {
    %c0_i32 = arith.constant 0 : i32
    %c0_i32_0 = arith.constant 0 : i32
    %c0_i32_1 = arith.constant 0 : i32
    return %c0_i32, %c0_i32_0 : i32, i32
  }
  func.func @transform_5(%arg0: i32) -> (i32, i32) {
    %c0_i32 = arith.constant 0 : i32
    %c0_i32_0 = arith.constant 0 : i32
    %c0_i32_1 = arith.constant 0 : i32
    return %c0_i32, %c0_i32_0 : i32, i32
  }
  func.func @transform_6(%arg0: i32) -> (i32, i32) {
    %c0_i32 = arith.constant 0 : i32
    %c0_i32_0 = arith.constant 0 : i32
    %c0_i32_1 = arith.constant 0 : i32
    return %c0_i32, %c0_i32_0 : i32, i32
  }
  func.func @transform_7(%arg0: i32) -> (i32, i32) {
    %c0_i32 = arith.constant 0 : i32
    %c0_i32_0 = arith.constant 0 : i32
    %c0_i32_1 = arith.constant 0 : i32
    return %c0_i32, %c0_i32_0 : i32, i32
  }
  func.func @transform_8(%arg0: i32) -> (i32, i32) {
    %c0_i32 = arith.constant 0 : i32
    %c0_i32_0 = arith.constant 0 : i32
    %c0_i32_1 = arith.constant 0 : i32
    return %c0_i32, %c0_i32_0 : i32, i32
  }
  func.func @transform_9(%arg0: i32) -> (i32, i32) {
    %c0_i32 = arith.constant 0 : i32
    %c0_i32_0 = arith.constant 0 : i32
    return %arg0, %c0_i32 : i32, i32
  }
}

</mosaic_0001>

<bundles_post_ra>
// kernel: tpu_custom_call.1
= control target key start
LH: loop header
LB: loop body
LE: loop exit
PB: predicated region body
PF: predicated region fallthrough
CT: control target
= control target key end

     0   :  { %v825_v1 = vmov 0   ;;  %vm159_vm0 = vcmask 261120   ;;  %v826_v52 = vmov 0.0   ;;  %vm827_vm1 = vmmov 0   ;;  %s1141_s0 = inlined_call_operand.vmem [shape: f32[128,32], index: 0, kind: input, shape index: {}]   ;;  %s1142_s2 = inlined_call_operand.vmem [shape: f32[64,1], index: 2, kind: input, shape index: {}]   ;;  %s1143_s1 = inlined_call_operand.vmem [shape: bf16[64,32], index: 1, kind: input, shape index: {}]   ;;  %s1144_s4 = inlined_call_operand.vmem [shape: f32[48,1], index: 4, kind: input, shape index: {}]   ;;  %s1145_s6 = inlined_call_operand.vmem [shape: f32[64,1], index: 6, kind: input, shape index: {}]   ;;  %s1146_s8 = inlined_call_operand.vmem [shape: f32[32,1], index: 8, kind: input, shape index: {}]   ;;  %s1147_s3 = inlined_call_operand.vmem [shape: bf16[48,64], index: 3, kind: input, shape index: {}]   ;;  %s1148_s5 = inlined_call_operand.vmem [shape: bf16[64,48], index: 5, kind: input, shape index: {}]   ;;  %s1149_s7 = inlined_call_operand.vmem [shape: bf16[32,64], index: 7, kind: input, shape index: {}]   ;;  %s1150_s9 = inlined_call_operand.vmem [shape: f32[128,32], index: 9, kind: output, shape index: {}]  }
   0x1   :  { %v33_v0 = vld [vmem:[%s1141_s0] sm:$0xff]  ;;  %810 = vset.pattern.permute.xlu1 %v825_v1  ;;  %v34_v2 = vld [vmem:[%s1141_s0 + $0x8] sm:$0xff]  ;;  %v35_v4 = vld [vmem:[%s1141_s0 + $0x10] sm:$0xff]  ;;  %761 = vmatprep.subr.bf16.mxu1 %v826_v52  ;;  %vm306_vm2 = vcmask 523264   ;;  %vm458_vm3 = vcmask 392192  }
   0x2   :  { %49 = vxpose.xlu0.b32.start [1/16] (narrow) %v33_v0, 32  ;;  %v91_v3 = vld [vmem:[%s1142_s2] sm:$0xff]  ;;  %v92_v5 = vld [vmem:[%s1142_s2 + $0x8] sm:$0xff]  ;;  %v36_v6 = vld [vmem:[%s1141_s0 + $0x18] sm:$0xff]  ;;  %769 = vmatprep.mubr.msk.bf16.mxu1 %vm827_vm1, %v826_v52 }
   0x3   :  { %101 = vperm.xlu1 %810, %v91_v3   ;;  %v93_v7 = vld [vmem:[%s1142_s2 + $0x10] sm:$0xff]  ;;  %v37_v8 = vld [vmem:[%s1141_s0 + $0x20] sm:$0xff]  ;;  %v94_v9 = vld [vmem:[%s1142_s2 + $0x18] sm:$0xff] }
   0x4   :  { %v38_v10 = vld [vmem:[%s1141_s0 + $0x28] sm:$0xff]  ;;  %v812_v11 = vld [vmem:[%s1143_s1] sm:$0xff]   ;;  %v39_v13 = vld [vmem:[%s1141_s0 + $0x30] sm:$0xff] }
   0x5   :  { %v95_v12 = vld [vmem:[%s1142_s2 + $0x20] sm:$0xff]  ;;  %753 = vmatprep.mubr.msk.bf16.mxu0 %vm159_vm0, %v812_v11  ;;  %v96_v14 = vld [vmem:[%s1142_s2 + $0x28] sm:$0xff]  ;;  %v40_v15 = vld [vmem:[%s1141_s0 + $0x38] sm:$0xff] }
   0x6   :  { %50 = vxpose.xlu0.b32.cont [2/16] (narrow) %v34_v2, 32  ;;  %v97_v16 = vld [vmem:[%s1142_s2 + $0x30] sm:$0xff]  ;;  %v41_v17 = vld [vmem:[%s1141_s0 + $0x40] sm:$0xff]  ;;  %v98_v18 = vld [vmem:[%s1142_s2 + $0x38] sm:$0xff] }
   0x7   :  { %106 = vperm.xlu1 %810, %v92_v5   ;;  %v42_v19 = vld [vmem:[%s1141_s0 + $0x48] sm:$0xff]  ;;  %v255_v20 = vld [vmem:[%s1144_s4] sm:$0xff]  ;;  %v43_v21 = vld [vmem:[%s1141_s0 + $0x50] sm:$0xff] }
   0x8   :  { %v256_v22 = vld [vmem:[%s1144_s4 + $0x8] sm:$0xff]  ;;  %v44_v23 = vld [vmem:[%s1141_s0 + $0x58] sm:$0xff]  ;;  %v257_v24 = vld [vmem:[%s1144_s4 + $0x10] sm:$0xff] }
   0x9   :  { %v45_v25 = vld [vmem:[%s1141_s0 + $0x60] sm:$0xff]  ;;  %v258_v26 = vld [vmem:[%s1144_s4 + $0x18] sm:$0xff]  ;;  %v46_v27 = vld [vmem:[%s1141_s0 + $0x68] sm:$0xff] }
   0xa   :  { %51 = vxpose.xlu0.b32.cont [3/16] (narrow) %v35_v4, 32  ;;  %v259_v28 = vld [vmem:[%s1144_s4 + $0x20] sm:$0xff]  ;;  %v47_v29 = vld [vmem:[%s1141_s0 + $0x70] sm:$0xff]  ;;  %v260_v30 = vld [vmem:[%s1144_s4 + $0x28] sm:$0xff] }
   0xb   :  { %111 = vperm.xlu1 %810, %v93_v7   ;;  %v48_v31 = vld [vmem:[%s1141_s0 + $0x78] sm:$0xff]  ;;  %v390_v32 = vld [vmem:[%s1145_s6] sm:$0xff]  ;;  %v391_v33 = vld [vmem:[%s1145_s6 + $0x8] sm:$0xff] }
   0xc   :  { %v393_v34 = vld [vmem:[%s1145_s6 + $0x18] sm:$0xff]  ;;  %v394_v35 = vld [vmem:[%s1145_s6 + $0x20] sm:$0xff]  ;;  %v395_v36 = vld [vmem:[%s1145_s6 + $0x28] sm:$0xff] }
   0xd   :  { %v396_v37 = vld [vmem:[%s1145_s6 + $0x30] sm:$0xff]  ;;  %v397_v38 = vld [vmem:[%s1145_s6 + $0x38] sm:$0xff]  ;;  %v552_v39 = vld [vmem:[%s1146_s8] sm:$0xff] }
   0xe   :  { %52 = vxpose.xlu0.b32.cont [4/16] (narrow) %v36_v6, 32  ;;  %v553_v40 = vld [vmem:[%s1146_s8 + $0x8] sm:$0xff]  ;;  %v554_v41 = vld [vmem:[%s1146_s8 + $0x10] sm:$0xff]  ;;  %v555_v42 = vld [vmem:[%s1146_s8 + $0x18] sm:$0xff] }
   0xf   :  { %116 = vperm.xlu1 %810, %v94_v9   ;;  %v813_v49 = vld [vmem:[%s1143_s1 + $0x8] sm:$0xff]   ;;  %v814_v50 = vld [vmem:[%s1143_s1 + $0x10] sm:$0xff]   ;;  %v815_v51 = vld [vmem:[%s1143_s1 + $0x18] sm:$0xff]  }
  0x12   :  { %53 = vxpose.xlu0.b32.cont [5/16] (narrow) %v37_v8, 32 }
  0x13   :  { %121 = vperm.xlu1 %810, %v95_v12  }
  0x16   :  { %54 = vxpose.xlu0.b32.cont [6/16] (narrow) %v38_v10, 32 }
  0x17   :  { %126 = vperm.xlu1 %810, %v96_v14  }
  0x1a   :  { %55 = vxpose.xlu0.b32.cont [7/16] (narrow) %v39_v13, 32 }
  0x1b   :  { %131 = vperm.xlu1 %810, %v97_v16  }
  0x1e   :  { %56 = vxpose.xlu0.b32.cont [8/16] (narrow) %v40_v15, 32 }
  0x1f   :  { %136 = vperm.xlu1 %810, %v98_v18  }
  0x22   :  { %57 = vxpose.xlu0.b32.cont [9/16] (narrow) %v41_v17, 32 }
  0x23   :  { %263 = vperm.xlu1 %810, %v255_v20  }
  0x26   :  { %58 = vxpose.xlu0.b32.cont [10/16] (narrow) %v42_v19, 32 }
  0x27   :  { %268 = vperm.xlu1 %810, %v256_v22  }
  0x2a   :  { %59 = vxpose.xlu0.b32.cont [11/16] (narrow) %v43_v21, 32 }
  0x2b   :  { %273 = vperm.xlu1 %810, %v257_v24  }
  0x2e   :  { %60 = vxpose.xlu0.b32.cont [12/16] (narrow) %v44_v23, 32 }
  0x2f   :  { %278 = vperm.xlu1 %810, %v258_v26   ;;  %v817_v26 = vld [vmem:[%s1147_s3 + $0x8] sm:$0xff]  }
  0x32   :  { %61 = vxpose.xlu0.b32.cont [13/16] (narrow) %v45_v25, 32  ;;  %v816_v25 = vld [vmem:[%s1147_s3] sm:$0xff]  }
  0x33   :  { %283 = vperm.xlu1 %810, %v259_v28   ;;  %v819_v28 = vld [vmem:[%s1148_s5] sm:$0xff]  }
  0x36   :  { %62 = vxpose.xlu0.b32.cont [14/16] (narrow) %v46_v27, 32  ;;  %v818_v27 = vld [vmem:[%s1147_s3 + $0x10] sm:$0xff]  }
  0x37   :  { %288 = vperm.xlu1 %810, %v260_v30  }
  0x3a   :  { %63 = vxpose.xlu0.b32.cont [15/16] (narrow) %v47_v29, 32  ;;  %v392_v29 = vld [vmem:[%s1145_s6 + $0x10] sm:$0xff] }
  0x3b   :  { %400 = vperm.xlu1 %810, %v390_v32  }
  0x3e   :  { %64 = vxpose.xlu0.b32.end [16/16] (narrow) %v48_v31, 32 }
  0x3f   :  { %405 = vperm.xlu1 %810, %v391_v33  }
  0x43   :  { %415 = vperm.xlu1 %810, %v393_v34  }
  0x47   :  { %420 = vperm.xlu1 %810, %v394_v35  }
  0x4b   :  { %425 = vperm.xlu1 %810, %v395_v36  }
  0x4f   :  { %430 = vperm.xlu1 %810, %v396_v37  }
  0x53   :  { %435 = vperm.xlu1 %810, %v397_v38  }
  0x57   :  { %558 = vperm.xlu1 %810, %v552_v39  }
  0x5b   :  { %563 = vperm.xlu1 %810, %v553_v40  }
  0x5f   :  { %568 = vperm.xlu1 %810, %v554_v41  }
  0x63   :  { %573 = vperm.xlu1 %810, %v555_v42  }
  0x67   :  { %811 = vset.pattern.permute.xlu0 %v825_v1 }
  0x68   :  { %410 = vperm.xlu0 %811, %v392_v29  }
  0x82   :  { %v1007_v43 = vpop.trf.xlu0  ;;  %v102_v53 = vpop.permute.xlu1 %101 }
  0x86   :  { %v1009_v44 = vpop.trf.xlu0  ;;  %v107_v54 = vpop.permute.xlu1 %106 }
  0x87   :  { %v89_v45 = vpack.c.bf16 %v1009_v44, %v1007_v43 }
  0x89   :  { %749 = vmatprep.subr.bf16.mxu0 %v89_v45 }
  0x8a   :  { %750 = vmatpush3.bf16.msra.mxu0 %v89_v45  ;;  %v1013_v46 = vpop.trf.xlu0  ;;  %v112_v55 = vpop.permute.xlu1 %111 }
  0x8e   :  { %v1015_v47 = vpop.trf.xlu0  ;;  %v117_v56 = vpop.permute.xlu1 %116 }
  0x8f   :  { %v90_v48 = vpack.c.bf16 %v1015_v47, %v1013_v46 }
  0x91   :  { %751 = vmatprep.subr.bf16.mxu0 %v90_v48 }
  0x92   :  { %752 = vmatpush3.bf16.msra.mxu0 %v90_v48  ;;  %v122_v57 = vpop.permute.xlu1 %121 }
  0x95   :  { %754 = vmatmul.mubr.msk.bf16.vlgmr.msra.gmra.mrb[0].mxu0 %vm159_vm0, %v813_v49 }
  0x96   :  { %757 = vmatprep.mubr.msk.bf16.mxu0 %vm159_vm0, %v814_v50  ;;  %v127_v58 = vpop.permute.xlu1 %126 }
  0x9a   :  { %v132_v2 = vpop.permute.xlu1 %131 }
  0x9d   :  { %758 = vmatmul.mubr.msk.bf16.gmra.mrb[4].mxu0 %vm159_vm0, %v815_v51 }
  0x9e   :  { %v137_v13 = vpop.permute.xlu1 %136  ;;  %787 = vmatprep.mubr.msk.bf16.mxu0 %vm458_vm3, %v819_v28 }
  0xa2   :  { %v264_v30 = vpop.permute.xlu1 %263 }
  0xa6   :  { %v269_v31 = vpop.permute.xlu1 %268 }
  0xaa   :  { %v274_v32 = vpop.permute.xlu1 %273 }
  0xae   :  { %v279_v41 = vpop.permute.xlu1 %278 }
 0x168   :  { %v755_v59 = vpop.f32.mrb[0].mxu0 }
 0x169   :  { %v215_v60 = vadd.f32 %v755_v59, %v112_v55  ;;  %v206_v61 = vpop.f32.mrb[1].mxu0 }
 0x16a   :  { %v207_v62 = vadd.f32 %v206_v61, %v102_v53  ;;  %v756_v63 = vpop.f32.mrb[2].mxu0  ;;  %v284_v53 = vpop.permute.xlu1 %283 }
 0x16b   :  { %v218_v0 = vadd.f32 %v756_v63, %v117_v56  ;;  %v209_v1 = vpop.f32.mrb[3].mxu0  ;;  %v239_v4 = vmax.f32 %v215_v60, 0.0 }
 0x16c   :  { %v210_v3 = vadd.f32 %v209_v1, %v107_v54  ;;  %v237_v6 = vmax.f32 %v207_v62, 0.0 }
 0x16d   :  { %v240_v5 = vmax.f32 %v218_v0, 0.0 }
 0x16e   :  { %v238_v7 = vmax.f32 %v210_v3, 0.0  ;;  %v289_v60 = vpop.permute.xlu1 %288  ;;  %v820_v3 = vld [vmem:[%s1148_s5 + $0x8] sm:$0xff]  }
 0x16f   :  { %v252_v8 = vpack.c.bf16 %v240_v5, %v239_v4  ;;  %v821_v4 = vld [vmem:[%s1148_s5 + $0x10] sm:$0xff]   ;;  %v822_v5 = vld [vmem:[%s1148_s5 + $0x18] sm:$0xff]  }
 0x170   :  { %v759_v9 = vpop.f32.mrb[4].mxu0  ;;  %v251_v10 = vpack.c.bf16 %v238_v7, %v237_v6  ;;  %v823_v6 = vld [vmem:[%s1149_s7] sm:$0xff]  }
 0x171   :  { %v231_v11 = vadd.f32 %v759_v9, %v132_v2  ;;  %v222_v12 = vpop.f32.mrb[5].mxu0 }
 0x172   :  { %v223_v14 = vadd.f32 %v222_v12, %v122_v57  ;;  %v760_v15 = vpop.f32.mrb[6].mxu0  ;;  %762 = vmatpush3.bf16.msra.mxu1 %v251_v10  ;;  %v401_v7 = vpop.permute.xlu1 %400 }
 0x173   :  { %v234_v16 = vadd.f32 %v760_v15, %v137_v13  ;;  %v225_v17 = vpop.f32.mrb[7].mxu0  ;;  %763 = vmatprep.subr.bf16.mxu1 %v826_v52  ;;  %v243_v19 = vmax.f32 %v231_v11, 0.0  ;;  %v411_v12 = vpop.permute.xlu0 %410 }
 0x174   :  { %v226_v18 = vadd.f32 %v225_v17, %v127_v58  ;;  %v241_v21 = vmax.f32 %v223_v14, 0.0 }
 0x175   :  { %v244_v20 = vmax.f32 %v234_v16, 0.0 }
 0x176   :  { %v242_v22 = vmax.f32 %v226_v18, 0.0  ;;  %764 = vmatpush3.bf16.msra.mxu1 %v252_v8  ;;  %v406_v8 = vpop.permute.xlu1 %405 }
 0x177   :  { %v254_v23 = vpack.c.bf16 %v244_v20, %v243_v19  ;;  %765 = vmatprep.subr.bf16.mxu1 %v826_v52 }
 0x178   :  { %v253_v24 = vpack.c.bf16 %v242_v22, %v241_v21 }
 0x17a   :  { %766 = vmatpush3.bf16.msra.mxu1 %v253_v24  ;;  %v416_v9 = vpop.permute.xlu1 %415 }
 0x17b   :  { %767 = vmatprep.subr.bf16.mxu1 %v826_v52 }
 0x17e   :  { %768 = vmatpush3.bf16.msra.mxu1 %v254_v23  ;;  %v421_v10 = vpop.permute.xlu1 %420 }
 0x181   :  { %770 = vmatmul.mubr.msk.bf16.vlgmr.msra.gmra.mrb[0].mxu1 %vm306_vm2, %v816_v25 }
 0x182   :  { %773 = vmatprep.mubr.msk.bf16.mxu1 %vm827_vm1, %v826_v52  ;;  %v426_v11 = vpop.permute.xlu1 %425 }
 0x186   :  { %v431_v20 = vpop.permute.xlu1 %430 }
 0x189   :  { %774 = vmatmul.mubr.msk.bf16.gmra.mrb[4].mxu1 %vm306_vm2, %v817_v26 }
 0x18a   :  { %777 = vmatprep.mubr.msk.bf16.mxu1 %vm827_vm1, %v826_v52 }
 0x191   :  { %778 = vmatmul.mubr.msk.bf16.gmra.mrb[8].mxu1 %vm306_vm2, %v818_v27 }
 0x254   :  { %v350_v33 = vpop.f32.mrb[0].mxu1 }
 0x255   :  { %v351_v34 = vadd.f32 %v350_v33, %v264_v30  ;;  %v771_v35 = vpop.f32.mrb[1].mxu1 }
 0x256   :  { %v353_v36 = vpop.f32.mrb[2].mxu1 }
 0x257   :  { %v354_v37 = vadd.f32 %v353_v36, %v269_v31  ;;  %v772_v38 = vpop.f32.mrb[3].mxu1  ;;  %v373_v39 = vmax.f32 %v351_v34, 0.0  ;;  %v436_v31 = vpop.permute.xlu1 %435 }
 0x259   :  { %v374_v40 = vmax.f32 %v354_v37, 0.0 }
 0x25b   :  { %v387_v42 = vpack.c.bf16 %v374_v40, %v373_v39 }
 0x25c   :  { %v358_v45 = vpop.f32.mrb[4].mxu1 }
 0x25d   :  { %v359_v48 = vadd.f32 %v358_v45, %v274_v32  ;;  %v775_v49 = vpop.f32.mrb[5].mxu1  ;;  %781 = vmatprep.subr.bf16.mxu0 %v387_v42  ;;  %v824_v45 = vld [vmem:[%s1149_s7 + $0x8] sm:$0xff]  }
 0x25e   :  { %v361_v50 = vpop.f32.mrb[6].mxu1  ;;  %782 = vmatpush3.bf16.msra.mxu0 %v387_v42 }
 0x25f   :  { %v362_v51 = vadd.f32 %v361_v50, %v279_v41  ;;  %v776_v52 = vpop.f32.mrb[7].mxu1  ;;  %v375_v54 = vmax.f32 %v359_v48, 0.0  ;;  %v559_v48 = vpop.permute.xlu1 %558 }
 0x261   :  { %v376_v55 = vmax.f32 %v362_v51, 0.0 }
 0x263   :  { %v388_v56 = vpack.c.bf16 %v376_v55, %v375_v54  ;;  %v564_v49 = vpop.permute.xlu1 %563 }
 0x264   :  { %v366_v57 = vpop.f32.mrb[8].mxu1 }
 0x265   :  { %v367_v58 = vadd.f32 %v366_v57, %v284_v53  ;;  %v779_v59 = vpop.f32.mrb[9].mxu1  ;;  %783 = vmatprep.subr.bf16.mxu0 %v388_v56 }
 0x266   :  { %v369_v61 = vpop.f32.mrb[10].mxu1  ;;  %784 = vmatpush3.bf16.msra.mxu0 %v388_v56 }
 0x267   :  { %v370_v62 = vadd.f32 %v369_v61, %v289_v60  ;;  %v780_v63 = vpop.f32.mrb[11].mxu1  ;;  %v377_v0 = vmax.f32 %v367_v58, 0.0  ;;  %v569_v57 = vpop.permute.xlu1 %568 }
 0x269   :  { %v378_v1 = vmax.f32 %v370_v62, 0.0 }
 0x26b   :  { %v389_v2 = vpack.c.bf16 %v378_v1, %v377_v0  ;;  %v574_v60 = vpop.permute.xlu1 %573 }
 0x26d   :  { %785 = vmatprep.subr.bf16.mxu0 %v389_v2 }
 0x26e   :  { %786 = vmatpush3.bf16.msra.mxu0 %v389_v2 }
 0x271   :  { %788 = vmatmul.mubr.msk.bf16.vlgmr.msra.gmra.mrb[8].mxu0 %vm458_vm3, %v820_v3 }
 0x272   :  { %791 = vmatprep.mubr.msk.bf16.mxu0 %vm458_vm3, %v821_v4 }
 0x279   :  { %792 = vmatmul.mubr.msk.bf16.gmra.mrb[12].mxu0 %vm458_vm3, %v822_v5 }
 0x27a   :  { %803 = vmatprep.mubr.msk.bf16.mxu0 %vm306_vm2, %v823_v6 }
 0x344   :  { %v789_v13 = vpop.f32.mrb[8].mxu0 }
 0x345   :  { %v505_v14 = vpop.f32.mrb[9].mxu0  ;;  %v514_v15 = vadd.f32 %v789_v13, %v411_v12 }
 0x346   :  { %v506_v16 = vadd.f32 %v505_v14, %v401_v7  ;;  %v790_v17 = vpop.f32.mrb[10].mxu0 }
 0x347   :  { %v517_v18 = vadd.f32 %v790_v17, %v416_v9  ;;  %v508_v19 = vpop.f32.mrb[11].mxu0  ;;  %v538_v22 = vmax.f32 %v514_v15, 0.0 }
 0x348   :  { %v509_v21 = vadd.f32 %v508_v19, %v406_v8  ;;  %v536_v24 = vmax.f32 %v506_v16, 0.0 }
 0x349   :  { %v539_v23 = vmax.f32 %v517_v18, 0.0 }
 0x34a   :  { %v537_v25 = vmax.f32 %v509_v21, 0.0 }
 0x34b   :  { %v549_v26 = vpack.c.bf16 %v539_v23, %v538_v22 }
 0x34c   :  { %v548_v27 = vpack.c.bf16 %v537_v25, %v536_v24  ;;  %v793_v28 = vpop.f32.mrb[12].mxu0 }
 0x34d   :  { %v530_v29 = vadd.f32 %v793_v28, %v431_v20  ;;  %v521_v30 = vpop.f32.mrb[13].mxu0 }
 0x34e   :  { %v522_v32 = vadd.f32 %v521_v30, %v421_v10  ;;  %v794_v33 = vpop.f32.mrb[14].mxu0  ;;  %795 = vmatprep.subr.bf16.mxu0 %v548_v27 }
 0x34f   :  { %v533_v34 = vadd.f32 %v794_v33, %v436_v31  ;;  %v524_v35 = vpop.f32.mrb[15].mxu0  ;;  %796 = vmatpush3.bf16.msra.mxu0 %v548_v27  ;;  %v542_v37 = vmax.f32 %v530_v29, 0.0 }
 0x350   :  { %v525_v36 = vadd.f32 %v524_v35, %v426_v11  ;;  %797 = vmatprep.subr.bf16.mxu0 %v549_v26  ;;  %v540_v39 = vmax.f32 %v522_v32, 0.0 }
 0x351   :  { %v543_v38 = vmax.f32 %v533_v34, 0.0 }
 0x352   :  { %v541_v40 = vmax.f32 %v525_v36, 0.0 }
 0x353   :  { %v551_v41 = vpack.c.bf16 %v543_v38, %v542_v37  ;;  %798 = vmatpush3.bf16.msra.mxu0 %v549_v26 }
 0x354   :  { %v550_v42 = vpack.c.bf16 %v541_v40, %v540_v39 }
 0x356   :  { %799 = vmatprep.subr.bf16.mxu0 %v550_v42 }
 0x357   :  { %800 = vmatpush3.bf16.msra.mxu0 %v550_v42 }
 0x358   :  { %801 = vmatprep.subr.bf16.mxu0 %v551_v41 }
 0x35b   :  { %802 = vmatpush3.bf16.msra.mxu0 %v551_v41 }
 0x35e   :  { %804 = vmatmul.mubr.msk.bf16.vlgmr.msra.gmra.mrb[16].mxu0 %vm306_vm2, %v824_v45 }
 0x431   :  { %v805_v50 = vpop.f32.mrb[16].mxu0 }
 0x432   :  { %v626_v51 = vpop.f32.mrb[17].mxu0  ;;  %v635_v58 = vadd.f32 %v805_v50, %v569_v57 }
 0x433   :  { %v627_v52 = vadd.f32 %v626_v51, %v559_v48  ;;  %v806_v53 = vpop.f32.mrb[18].mxu0 }
 0x434   :  { %v629_v54 = vpop.f32.mrb[19].mxu0  ;;  %v643_v61 = vadd.f32 %v635_v58, %v1013_v46  ;;  %v638_v62 = vadd.f32 %v806_v53, %v574_v60 }
 0x435   :  { %v641_v55 = vadd.f32 %v627_v52, %v1007_v43  ;;  %v630_v56 = vadd.f32 %v629_v54, %v564_v49 }
 0x436   :  { %v644_v63 = vadd.f32 %v638_v62, %v1015_v47 }
 0x437   :  { %645 = vxpose.xlu1.b32.start [1/4] (short) %v641_v55, 128  ;;  %v642_v59 = vadd.f32 %v630_v56, %v1009_v44 }
 0x43b   :  { %646 = vxpose.xlu1.b32.cont [2/4] (short) %v642_v59, 128 }
 0x43f   :  { %647 = vxpose.xlu1.b32.cont [3/4] (short) %v643_v61, 128 }
 0x443   :  { %648 = vxpose.xlu1.b32.end [4/4] (short) %v644_v63, 128 }
 0x4b7   :  { %v661_v0 = vpop.trf.xlu1 }
 0x4b8   :  { %677 = vst.msk [vmem:[%s1150_s9] sm:$0xff] %vm159_vm0, %v661_v0 }
 0x4bb   :  { %v662_v43 = vpop.trf.xlu1 }
 0x4bc   :  { %678 = vst.msk [vmem:[%s1150_s9 + $0x8] sm:$0xff] %vm159_vm0, %v662_v43 }
 0x4bf   :  { %v663_v44 = vpop.trf.xlu1 }
 0x4c0   :  { %679 = vst.msk [vmem:[%s1150_s9 + $0x10] sm:$0xff] %vm159_vm0, %v663_v44 }
 0x4c3   :  { %v664_v46 = vpop.trf.xlu1 }
 0x4c4   :  { %680 = vst.msk [vmem:[%s1150_s9 + $0x18] sm:$0xff] %vm159_vm0, %v664_v46 }
 0x4c7   :  { %v665_v47 = vpop.trf.xlu1 }
 0x4c8   :  { %681 = vst.msk [vmem:[%s1150_s9 + $0x20] sm:$0xff] %vm159_vm0, %v665_v47 }
 0x4cb   :  { %v666_v1 = vpop.trf.xlu1 }
 0x4cc   :  { %682 = vst.msk [vmem:[%s1150_s9 + $0x28] sm:$0xff] %vm159_vm0, %v666_v1 }
 0x4cf   :  { %v667_v2 = vpop.trf.xlu1 }
 0x4d0   :  { %683 = vst.msk [vmem:[%s1150_s9 + $0x30] sm:$0xff] %vm159_vm0, %v667_v2 }
 0x4d3   :  { %v668_v3 = vpop.trf.xlu1 }
 0x4d4   :  { %684 = vst.msk [vmem:[%s1150_s9 + $0x38] sm:$0xff] %vm159_vm0, %v668_v3 }
 0x4d7   :  { %v669_v4 = vpop.trf.xlu1 }
 0x4d8   :  { %685 = vst.msk [vmem:[%s1150_s9 + $0x40] sm:$0xff] %vm159_vm0, %v669_v4 }
 0x4db   :  { %v670_v5 = vpop.trf.xlu1 }
 0x4dc   :  { %686 = vst.msk [vmem:[%s1150_s9 + $0x48] sm:$0xff] %vm159_vm0, %v670_v5 }
 0x4df   :  { %v671_v6 = vpop.trf.xlu1 }
 0x4e0   :  { %687 = vst.msk [vmem:[%s1150_s9 + $0x50] sm:$0xff] %vm159_vm0, %v671_v6 }
 0x4e3   :  { %v672_v7 = vpop.trf.xlu1 }
 0x4e4   :  { %688 = vst.msk [vmem:[%s1150_s9 + $0x58] sm:$0xff] %vm159_vm0, %v672_v7 }
 0x4e7   :  { %v673_v8 = vpop.trf.xlu1 }
 0x4e8   :  { %689 = vst.msk [vmem:[%s1150_s9 + $0x60] sm:$0xff] %vm159_vm0, %v673_v8 }
 0x4eb   :  { %v674_v9 = vpop.trf.xlu1 }
 0x4ec   :  { %690 = vst.msk [vmem:[%s1150_s9 + $0x68] sm:$0xff] %vm159_vm0, %v674_v9 }
 0x4ef   :  { %v675_v10 = vpop.trf.xlu1 }
 0x4f0   :  { %691 = vst.msk [vmem:[%s1150_s9 + $0x70] sm:$0xff] %vm159_vm0, %v675_v10 }
 0x4f3   :  { %v676_v11 = vpop.trf.xlu1 }
 0x4f4   :  { %692 = vst.msk [vmem:[%s1150_s9 + $0x78] sm:$0xff] %vm159_vm0, %v676_v11 }

</bundles_post_ra>
